<compile_context>
chip_gen: v6e
topology: v6e:2x2x1
jax: 0.10.0
libtpu: 0.0.40
codegen_flags: <defaults>
</compile_context>

<pallas_src>
import jax
import jax.numpy as jnp
from jax import lax
from jax.experimental import pallas as pl
from jax.experimental.pallas import tpu as pltpu

EPS = 1e-5
_VMEM_LIMIT = 32 * 1024 * 1024   # explicit scoped-VMEM budget, safe on v5e/v6e/v7x


def _round_up(x, m):
    return ((x + m - 1) // m) * m


def _stats_kernel(p_ref, w_ref, sum_ref, sq_ref):
    # p_ref: (TM, K) bf16   w_ref: (K, Cp) bf16
    # sum_ref / sq_ref: (1, 8, Cp) f32 per-tile partials (row-broadcast so the
    # stored block stays (8, 128)-aligned; glue reads row 0 of each tile).
    y = jnp.dot(p_ref[...], w_ref[...], preferred_element_type=jnp.float32)
    s = jnp.sum(y, axis=0)            # (Cp,)  VPU/XLU reduction, not MXU
    sq = jnp.sum(y * y, axis=0)       # (Cp,)
    sum_ref[...] = jnp.broadcast_to(s[None, None, :], sum_ref.shape)
    sq_ref[...] = jnp.broadcast_to(sq[None, None, :], sq_ref.shape)


def _apply_kernel(p_ref, w_ref, scale_ref, shift_ref, o_ref):
    # Recompute y = P @ W (cheap: MXU slack) and apply the fused BN FMA in f32.
    y = jnp.dot(p_ref[...], w_ref[...], preferred_element_type=jnp.float32)
    o_ref[...] = (y * scale_ref[...] + shift_ref[...]).astype(o_ref.dtype)


def conv_bn_forward(x_nchw, weight, bias, gamma, beta, *, stride=2, padding=1,
                    eps=EPS, tm=1024):
    """x_nchw: (N, Cin, H, W); weight: (Cout, Cin, KH, KW) (PyTorch layout).

    `bias` is accepted for API parity but unused: training-mode BatchNorm
    subtracts the batch mean, which cancels the conv bias exactly.
    """
    del bias  # absorbed by BN mean subtraction (training mode)

    N, Cin, H, W = x_nchw.shape
    Cout, _, KH, KW = weight.shape
    OH = (H + 2 * padding - KH) // stride + 1
    OW = (W + 2 * padding - KW) // stride + 1

    M = N * OH * OW
    K = KH * KW * Cin                    # NOT padded to 128 (full-dim block)
    Cp = _round_up(Cout, 128)            # lane-dense output channels / MXU N
    tm = max(16, min(_round_up(tm, 16), _round_up(M, 16)))  # bf16 sublane = 16
    Mp = _round_up(M, tm)
    n_tiles = Mp // tm

    # --- glue: im2col as one fused XLA chain (bf16 patches, unpadded K) ---
    # TODO(synk): stream the padded NHWC input directly in-kernel instead.
    x = jnp.transpose(x_nchw, (0, 2, 3, 1)).astype(jnp.bfloat16)   # NCHW->NHWC
    xp = jnp.pad(x, ((0, 0), (padding, padding), (padding, padding), (0, 0)))
    cols = [xp[:, ki:ki + stride * OH:stride, kj:kj + stride * OW:stride, :]
            for ki in range(KH) for kj in range(KW)]
    patches = jnp.concatenate(cols, axis=-1).reshape(M, K)
    if Mp > M:
        patches = jnp.pad(patches, ((0, Mp - M), (0, 0)))   # zero rows: harmless

    # weight (Cout,Cin,KH,KW) -> (KH,KW,Cin,Cout) -> (K,Cout), pad Cout only.
    w_flat = jnp.transpose(weight, (2, 3, 1, 0)).reshape(K, Cout)
    w_flat = jnp.pad(w_flat.astype(jnp.bfloat16), ((0, 0), (0, Cp - Cout)))

    flops = 2 * Mp * K * Cp
    patch_bytes = Mp * K * 2
    w_bytes = K * Cp * 2

    # --- pass 1: stats-only matmul (no y written to HBM) ---
    sum_part, sq_part = pl.pallas_call(
        _stats_kernel,
        out_shape=(
            jax.ShapeDtypeStruct((n_tiles, 8, Cp), jnp.float32),
            jax.ShapeDtypeStruct((n_tiles, 8, Cp), jnp.float32),
        ),
        grid=(n_tiles,),
        in_specs=[
            pl.BlockSpec((tm, K), lambda i: (i, 0)),
            pl.BlockSpec((K, Cp), lambda i: (0, 0)),
        ],
        out_specs=(
            pl.BlockSpec((1, 8, Cp), lambda i: (i, 0, 0)),
            pl.BlockSpec((1, 8, Cp), lambda i: (i, 0, 0)),
        ),
        compiler_params=pltpu.CompilerParams(
            dimension_semantics=("parallel",),       # per-tile partials -> no
            vmem_limit_bytes=_VMEM_LIMIT),           # resident accumulator
        cost_estimate=pl.CostEstimate(
            flops=flops, transcendentals=0,
            bytes_accessed=patch_bytes + w_bytes + 2 * n_tiles * 8 * Cp * 4),
    )(patches, w_flat)

    # --- tiny (Cp,) glue: batch stats -> fused scale/shift ---
    csum = jnp.sum(sum_part[:, 0, :], axis=0)
    csq = jnp.sum(sq_part[:, 0, :], axis=0)
    mean = csum / float(M)                       # padded rows contribute zeros
    # NOTE: E[y^2]-E[y]^2 in f32 is fine at these scales; use a mean-shifted
    # accumulation for very large M with large per-channel means.
    var = jnp.maximum(csq / float(M) - mean * mean, 0.0)   # biased variance
    inv = lax.rsqrt(var + eps)
    gamma_p = jnp.pad(gamma.astype(jnp.float32), (0, Cp - Cout))
    beta_p = jnp.pad(beta.astype(jnp.float32), (0, Cp - Cout))
    scale_v = gamma_p * inv
    shift_v = beta_p - mean * scale_v
    scale = scale_v.reshape(1, Cp)
    shift = shift_v.reshape(1, Cp)

    # --- pass 2: recompute matmul + fused normalize, lane-dense stores ---
    out_pad = pl.pallas_call(
        _apply_kernel,
        out_shape=jax.ShapeDtypeStruct((Mp, Cp), jnp.float32),
        grid=(n_tiles,),
        in_specs=[
            pl.BlockSpec((tm, K), lambda i: (i, 0)),
            pl.BlockSpec((K, Cp), lambda i: (0, 0)),
            pl.BlockSpec((1, Cp), lambda i: (0, 0)),
            pl.BlockSpec((1, Cp), lambda i: (0, 0)),
        ],
        out_specs=pl.BlockSpec((tm, Cp), lambda i: (i, 0)),
        compiler_params=pltpu.CompilerParams(
            dimension_semantics=("parallel",),
            vmem_limit_bytes=_VMEM_LIMIT),
        cost_estimate=pl.CostEstimate(
            flops=flops + 2 * Mp * Cp, transcendentals=0,
            bytes_accessed=patch_bytes + w_bytes + Mp * Cp * 4),
    )(patches, w_flat, scale, shift)

    # --- glue: slice off padding, (M, Cout) -> NCHW (module contract) ---
    out = out_pad[:M, :Cout].reshape(N, OH, OW, Cout)
    return jnp.transpose(out, (0, 3, 1, 2))


if __name__ == "__main__":
    N, Cin, H, W = 2, 4, 16, 16
    Cout, KH, KW = 8, 4, 4

    key = jax.random.PRNGKey(0)
    kx, kw, kb = jax.random.split(key, 3)

    x = jax.random.normal(kx, (N, Cin, H, W), dtype=jnp.float32)

    fan_in = Cin * KH * KW
    bound = 1.0 / float(fan_in) ** 0.5
    weight = jax.random.uniform(kw, (Cout, Cin, KH, KW), minval=-bound,
                                maxval=bound, dtype=jnp.float32)
    bias = jax.random.uniform(kb, (Cout,), minval=-bound, maxval=bound,
                              dtype=jnp.float32)
    gamma = jnp.ones((Cout,), jnp.float32)   # BatchNorm weight
    beta = jnp.zeros((Cout,), jnp.float32)   # BatchNorm bias

    # tm=64 -> grid of 2 tiles so the per-tile partial-stats reduction path is
    # exercised even at this toy size.
    out = conv_bn_forward(x, weight, bias, gamma, beta, stride=2, padding=1,
                          tm=64)
    out = jax.block_until_ready(out)
    assert out.shape == (N, Cout, H // 2, W // 2), out.shape

    # Reference (f32 conv + training-mode BN) — loose tolerance for bf16 MXU.
    ref_conv = lax.conv_general_dilated(
        x, weight, window_strides=(2, 2), padding=((1, 1), (1, 1)),
        dimension_numbers=("NCHW", "OIHW", "NCHW"))
    ref_conv = ref_conv + bias.reshape(1, Cout, 1, 1)
    m = jnp.mean(ref_conv, axis=(0, 2, 3), keepdims=True)
    v = jnp.mean((ref_conv - m) ** 2, axis=(0, 2, 3), keepdims=True)
    ref = ((ref_conv - m) * lax.rsqrt(v + EPS) * gamma.reshape(1, Cout, 1, 1)
           + beta.reshape(1, Cout, 1, 1))
    max_err = float(jnp.max(jnp.abs(out - ref)))
    assert max_err < 0.1, f"max abs error vs reference: {max_err}"

    print("KERNEL_OK")
</pallas_src>

<mosaic_0001>
module attributes {stable_mosaic.version = 11 : i64} {
  func.func @_stats_kernel(%arg0: i32, %arg1: memref<64x64xbf16, #tpu.memory_space<vmem>>, %arg2: memref<64x128xbf16, #tpu.memory_space<vmem>>, %arg3: memref<1x8x128xf32, #tpu.memory_space<vmem>>, %arg4: memref<1x8x128xf32, #tpu.memory_space<vmem>>) attributes {dimension_semantics = [#tpu.dimension_semantics<parallel>], iteration_bounds = array<i64: 2>, scalar_prefetch = 0 : i64, scratch_operands = 0 : i64, tpu.core_type = #tpu.core_type<tc>, window_params = [{transform_indices = @transform_0, window_bounds = array<i64: 64, 64>}, {pipeline_mode = #tpu.pipeline_mode<synchronous>, transform_indices = @transform_1, window_bounds = array<i64: 64, 128>}, {transform_indices = @transform_2, window_bounds = array<i64: 1, 8, 128>}, {transform_indices = @transform_3, window_bounds = array<i64: 1, 8, 128>}]} {
    %c0 = arith.constant 0 : index
    %c0_0 = arith.constant 0 : index
    %0 = vector.load %arg1[%c0, %c0_0] : memref<64x64xbf16, #tpu.memory_space<vmem>>, vector<64x64xbf16>
    %c0_1 = arith.constant 0 : index
    %c0_2 = arith.constant 0 : index
    %1 = vector.load %arg2[%c0_1, %c0_2] : memref<64x128xbf16, #tpu.memory_space<vmem>>, vector<64x128xbf16>
    %cst = arith.constant dense<0.000000e+00> : vector<64x128xf32>
    %2 = tpu.matmul %0, %1, %cst {dimension_numbers = #tpu.dot_dimension_numbers<[1], [0], [0], [1], [0, 0, 1, 1], [], []>} : vector<64x64xbf16>, vector<64x128xbf16>, vector<64x128xf32> -> vector<64x128xf32>
    %cst_3 = arith.constant dense<0.000000e+00> : vector<128xf32>
    %3 = vector.multi_reduction <add>, %2, %cst_3 [0] : vector<64x128xf32> to vector<128xf32>
    %4 = arith.mulf %2, %2 : vector<64x128xf32>
    %cst_4 = arith.constant dense<0.000000e+00> : vector<128xf32>
    %5 = vector.multi_reduction <add>, %4, %cst_4 [0] : vector<64x128xf32> to vector<128xf32>
    %6 = vector.shape_cast %3 : vector<128xf32> to vector<1x1x128xf32>
    %7 = vector.shape_cast %6 : vector<1x1x128xf32> to vector<1x1x128xf32>
    %8 = vector.broadcast %7 : vector<1x1x128xf32> to vector<1x8x128xf32>
    %c0_5 = arith.constant 0 : index
    %c0_6 = arith.constant 0 : index
    %c0_7 = arith.constant 0 : index
    %9 = vector.load %arg3[%c0_5, %c0_6, %c0_7] : memref<1x8x128xf32, #tpu.memory_space<vmem>>, vector<1x8x128xf32>
    tpu.vector_store %arg3[%c0_5, %c0_6, %c0_7], %8 {strides = array<i32>} : memref<1x8x128xf32, #tpu.memory_space<vmem>>, vector<1x8x128xf32>,
    %10 = vector.shape_cast %5 : vector<128xf32> to vector<1x1x128xf32>
    %11 = vector.shape_cast %10 : vector<1x1x128xf32> to vector<1x1x128xf32>
    %12 = vector.broadcast %11 : vector<1x1x128xf32> to vector<1x8x128xf32>
    %c0_8 = arith.constant 0 : index
    %c0_9 = arith.constant 0 : index
    %c0_10 = arith.constant 0 : index
    %13 = vector.load %arg4[%c0_8, %c0_9, %c0_10] : memref<1x8x128xf32, #tpu.memory_space<vmem>>, vector<1x8x128xf32>
    tpu.vector_store %arg4[%c0_8, %c0_9, %c0_10], %12 {strides = array<i32>} : memref<1x8x128xf32, #tpu.memory_space<vmem>>, vector<1x8x128xf32>,
    return
  }
  func.func @transform_0(%arg0: i32) -> (i32, i32) {
    %c0_i32 = arith.constant 0 : i32
    %c0_i32_0 = arith.constant 0 : i32
    return %arg0, %c0_i32 : i32, i32
  }
  func.func @transform_1(%arg0: i32) -> (i32, i32) {
    %c0_i32 = arith.constant 0 : i32
    %c0_i32_0 = arith.constant 0 : i32
    %c0_i32_1 = arith.constant 0 : i32
    return %c0_i32, %c0_i32_0 : i32, i32
  }
  func.func @transform_2(%arg0: i32) -> (i32, i32, i32) {
    %c0_i32 = arith.constant 0 : i32
    %c0_i32_0 = arith.constant 0 : i32
    %c0_i32_1 = arith.constant 0 : i32
    return %arg0, %c0_i32, %c0_i32_0 : i32, i32, i32
  }
  func.func @transform_3(%arg0: i32) -> (i32, i32, i32) {
    %c0_i32 = arith.constant 0 : i32
    %c0_i32_0 = arith.constant 0 : i32
    %c0_i32_1 = arith.constant 0 : i32
    return %arg0, %c0_i32, %c0_i32_0 : i32, i32, i32
  }
}

</mosaic_0001>

<bundles_post_ra>
// kernel: tpu_custom_call.1
= control target key start
LH: loop header
LB: loop body
LE: loop exit
PB: predicated region body
PF: predicated region fallthrough
CT: control target
= control target key end

     0   :  { %9 = vsyncpa [#allocation3], 0  ;;  %s854_s0 = inlined_call_operand.vmem [shape: bf16[128,64], index: 0, kind: input, shape index: {}]   ;;  %s855_s1 = inlined_call_operand.vmem [shape: bf16[64,128], index: 1, kind: input, shape index: {}]   ;;  %s856_s2 = inlined_call_operand.hbm [shape: f32[2,8,128], index: 2, kind: output, shape index: {0}]   ;;  %s857_s3 = inlined_call_operand.hbm [shape: f32[2,8,128], index: 3, kind: output, shape index: {1}]  }
   0x1   :  { %11 = vsyncpa [#allocation3 + $0x1], 0 }
   0x2   :  { %12 = vsyncpa [#allocation5], 0 }
   0x3   :  { %14 = vsyncpa [#allocation5 + $0x1], 0  ;;  %s704_s12 = smov 0   ;;  %s706_s13 = smov 0  }
   0x4   :  { %s708_s14 = smov 0   ;;  %s710_s15 = smov 0  }
   0x5 LB: > { %s725_s16 = sadd.s32 4294967295, %s680_s15   ;;  %s480_s17 = sadd.s32 4294967294, %s680_s15   ;;  %s680_s15 = sphi %s710_s15, %s863_s15   ;;  %s676_s14 = sphi %s708_s14, %s862_s14   ;;  %s672_s13 = sphi %s706_s13, %s861_s13   ;;  %s668_s12 = sphi %s704_s12, %s860_s12  }
   0x6   : > { %s729_s18 = sadd.s32 1, %s680_s15   ;;  %s74_s19 = sadd.s32 1, %s676_s14 }
   0x7   : > { %s71_s20 = ssub.s32 %s680_s15, %s729_s18  ;;  %p84_p0 = scmp.ne.s32.totalorder %s676_s14, %s672_s13 }
   0x8   : > { %p72_p1 = scmp.eq.s32.totalorder %s71_s20, 0  ;;  %p85_p2 = scmp.eq.s32.totalorder %s725_s16, 1 }
   0x9   : > { %p90_p3 = scmp.ne.s32.totalorder %s672_s13, %s668_s12  ;;  %p91_p4 = scmp.eq.s32.totalorder %s480_s17, 1 }
   0xa   : > { %s740_s21 = scalar_select %p72_p1, %s676_s14, %s74_s19  }
   0xb   : > { %p742_p5 = por %p85_p2, %p84_p0  ;;  %p746_p6 = por %p91_p4, %p90_p3 }
   0xc   : > { %p483_p7 = scmp.ge.s32.totalorder %s680_s15, 1  ;;  %p147_p8 = scmp.lt.s32.totalorder %s680_s15, 3 }
   0xe   : > { %p148_p9 = pnand %p483_p7, %p147_p8 }
   0xf   : > { %s486_s26 = sshll.u32 (!%p148_p9), %s725_s16, 3  ;;  %s773_s10 = sand.u32 (!%p148_p9), 1, %s672_s13  }
  0x10   : > { %151 = sbr.rel (%p148_p9) target bundleno = 298 (0x12a), region = 28  ;;  %p177_p10 = scmp.lt.s32.totalorder (!%p148_p9), %s486_s26, 15 }
  0x11   : > { %s484_s11 = sshll.u32 (!%p148_p9), %s773_s10, 3  ;;  %s502_s17 = sshll.u32 (!%p148_p9), %s725_s16, 7 }
  0x12   : > { %s168_s19 = scalar_lea.vmem (!%p148_p9), [#allocation2], %s484_s11  ;;  %s777_s24 = scalar_lea.vmem (!%p148_p9), [#allocation4], %s484_s11 }
  0x13   : > { %s376_s20 = sshll.u32 (!%p148_p9), %s168_s19, 4  ;;  %s389_s25 = sshll.u32 (!%p148_p9), %s777_s24, 4  ;;  %s785_s20 = int_to_ptr.vmem [resolvable:$true] %s376_s20  ;;  %s792_s25 = int_to_ptr.vmem [resolvable:$true] %s389_s25 }
  0x14   : > { %s783_s28 = scalar_lea.hbm (!%p148_p9), %s856_s2, %s502_s17  ;;  %s790_s30 = scalar_lea.hbm (!%p148_p9), %s857_s3, %s502_s17 }
  0x15   : > { %v582_v0 = vld [vmem:[%s855_s1 + $0x18] sm:$0xff]   ;;  %v583_v1 = vld [vmem:[%s855_s1 + $0x10] sm:$0xff]   ;;  %s865_s26 = smov (!%p177_p10, %s486_s26), 15  ;;  %v584_v2 = vld [vmem:[%s855_s1 + $0x8] sm:$0xff]   ;;  %vm243_vm0 = vcmask 523264   ;;  %s590_s5 = scalar_lea.vmem %s785_s20, 128 }
  0x16   : > { %514 = vmatprep.subr.bf16.mxu0 %v582_v0  ;;  %530 = vmatprep.subr.bf16.mxu1 %v582_v0  ;;  %s487_s4 = sshll.u32 %s865_s26, 2  ;;  %v585_v4 = vld [vmem:[%s855_s1] sm:$0xff]   ;;  %p591_p11 = scmp.ne.s32.totalorder %s785_s20, %s590_s5 }
  0x17   : > { %515 = vmatpush3.bf16.msra.mxu0 %v582_v0  ;;  %534 = vmatpush3.bf16.msra.mxu1 %v582_v0  ;;  %s180_s7 = scalar_lea.vmem %s854_s0, %s487_s4  ;;  %s358_s4 = scalar_lea.sflag [#allocation3], %s773_s10 }
  0x18   : > { %516 = vmatprep.subr.bf16.mxu0 %v583_v1  ;;  %531 = vmatprep.subr.bf16.mxu1 %v583_v1  ;;  %v586_v3 = vld [vmem:[%s180_s7] sm:$0xff]   ;;  %v588_v5 = vld [vmem:[%s180_s7 + $0x10] sm:$0xff]   ;;  %v587_v6 = vld [vmem:[%s180_s7 + $0x8] sm:$0xff]   ;;  %p592_p12 = pnand %p591_p11, %p742_p5  ;;  %s682_s6 = smov [#allocation2]  }
  0x19   : > { %522 = vmatprep.mubr.msk.bf16.mxu0 %vm243_vm0, %v586_v3  ;;  %526 = vmatprep.mubr.msk.bf16.mxu1 %vm243_vm0, %v588_v5  ;;  %v589_v7 = vld [vmem:[%s180_s7 + $0x18] sm:$0xff]   ;;  %s594_s7 = sshll.u32 %s682_s6, 4  ;;  %s595_s7 = int_to_ptr.vmem [resolvable:$false] %s594_s7 }
  0x1a   : > { %p593_p13 = pneg %p592_p12  ;;  %s596_s8 = scalar_lea.vmem %s595_s7, 256 }
  0x1b   : > { %517 = vmatpush3.bf16.msra.mxu0 %v583_v1  ;;  %535 = vmatpush3.bf16.msra.mxu1 %v583_v1  ;;  %p597_p0 = scmp.lt.s32.totalorder %s785_s20, %s595_s7  ;;  %p598_p1 = scmp.lt.s32.totalorder %s596_s8, %s590_s5 }
  0x1c   : > { %518 = vmatprep.subr.bf16.mxu0 %v584_v2  ;;  %532 = vmatprep.subr.bf16.mxu1 %v584_v2 }
  0x1d   : > { %p599_p2 = por %p598_p1, %p597_p0 }
  0x1f   : > { %519 = vmatpush3.bf16.msra.mxu0 %v584_v2  ;;  %536 = vmatpush3.bf16.msra.mxu1 %v584_v2  ;;  %p600_p3 = pnand %p599_p2, %p593_p13 }
  0x20   : > { %520 = vmatprep.subr.bf16.mxu0 %v585_v4  ;;  %533 = vmatprep.subr.bf16.mxu1 %v585_v4 }
  0x23   : > { %521 = vmatpush3.bf16.msra.mxu0 %v585_v4  ;;  %537 = vmatpush3.bf16.msra.mxu1 %v585_v4 }
  0x26   : > { %523 = vmatmul.mubr.msk.bf16.vlgmr.msra.gmra.mxu0 %vm243_vm0, %v587_v6  ;;  %527 = vmatmul.mubr.msk.bf16.vlgmr.msra.gmra.mxu1 %vm243_vm0, %v589_v7 }
  0xe6   : > { %v524_v8 = vpop.f32.mrf.mxu0  ;;  %v528_v9 = vpop.f32.mrf.mxu1 }
  0xe7   : > { %v336_v18 = vmul.f32 %v524_v8, %v524_v8  ;;  %v340_v31 = vmul.f32 %v528_v9, %v528_v9 }
  0xe8   : > { %v290_v10 = vpop.f32.mrf.mxu0  ;;  %v306_v12 = vpop.f32.mrf.mxu1 }
  0xe9   : > { %v334_v14 = vmul.f32 %v290_v10, %v290_v10  ;;  %v338_v25 = vmul.f32 %v306_v12, %v306_v12 }
  0xea   : > { %v525_v11 = vpop.f32.mrf.mxu0  ;;  %v529_v17 = vpop.f32.mrf.mxu1 }
  0xeb   : > { %v337_v21 = vmul.f32 %v525_v11, %v525_v11  ;;  %v341_v34 = vmul.f32 %v529_v17, %v529_v17 }
  0xec   : > { %v293_v13 = vpop.f32.mrf.mxu0  ;;  %v309_v24 = vpop.f32.mrf.mxu1 }
  0xed   : > { %v321_v15 = vadd.f32 %v293_v13, %v290_v10  ;;  %v335_v16 = vmul.f32 %v293_v13, %v293_v13  ;;  %v339_v29 = vmul.f32 %v309_v24, %v309_v24 }
  0xef   : > { %v322_v19 = vadd.f32 %v524_v8, %v321_v15  ;;  %v342_v20 = vadd.f32 %v335_v16, %v334_v14 }
  0xf1   : > { %v343_v22 = vadd.f32 %v342_v20, %v336_v18  ;;  %v323_v23 = vadd.f32 %v525_v11, %v322_v19 }
  0xf3   : > { %v324_v26 = vadd.f32 %v323_v23, %v306_v12  ;;  %v344_v27 = vadd.f32 %v343_v22, %v337_v21 }
  0xf5   : > { %v325_v28 = vadd.f32 %v324_v26, %v309_v24  ;;  %v345_v30 = vadd.f32 %v344_v27, %v338_v25 }
  0xf7   : > { %v326_v32 = vadd.f32 %v528_v9, %v325_v28  ;;  %v346_v33 = vadd.f32 %v345_v30, %v339_v29 }
  0xf9   : > { %v327_v35 = vadd.f32 %v529_v17, %v326_v32  ;;  %v347_v36 = vadd.f32 %v346_v33, %v340_v31 }
  0xfb   : > { %v328_v37 = vrot.slane %v327_v35, 4  ;;  %v348_v38 = vadd.f32 %v347_v36, %v341_v34 }
  0xfd   : > { %v329_v39 = vadd.f32 %v328_v37, %v327_v35  ;;  %v349_v40 = vrot.slane %v348_v38, 4 }
  0xff   : > { %v330_v41 = vrot.slane %v329_v39, 2  ;;  %v350_v42 = vadd.f32 %v349_v40, %v348_v38 }
 0x101   : > { %v331_v43 = vadd.f32 %v330_v41, %v329_v39  ;;  %v351_v44 = vrot.slane %v350_v42, 2 }
 0x103   : > { %v332_v45 = vrot.slane %v331_v43, 1  ;;  %v352_v46 = vadd.f32 %v351_v44, %v350_v42 }
 0x105   : > { %v333_v47 = vadd.f32 %v332_v45, %v331_v43  ;;  %v353_v48 = vrot.slane %v352_v46, 1 }
 0x107   : > { %355 = vst [vmem:[%s168_s19] sm:$0xff] %v333_v47  ;;  %v354_v49 = vadd.f32 %v353_v48, %v352_v46 }
 0x108   : > { %603 = shalt.err (!%p600_p3)
}
 0x109   : > { %s604_s9 = scalar_lea.hbm %s783_s28, 128  ;;  %s608_s19 = scalar_lea.hbm %s856_s2, 256 }
 0x10a   : > { %p605_p4 = scmp.ne.s32.totalorder %s783_s28, %s604_s9  ;;  %p609_p9 = scmp.lt.s32.totalorder %s783_s28, %s856_s2 }
 0x10b   : > { %p610_p10 = scmp.lt.s32.totalorder %s608_s19, %s604_s9 }
 0x10c   : > { %p606_p7 = pnand %p605_p4, %p742_p5 }
 0x10d   : > { %p611_p11 = por %p610_p10, %p609_p9 }
 0x10e   : > { %p607_p8 = pneg %p606_p7 }
 0x110   : > { %p612_p12 = pnand %p611_p11, %p607_p8 }
 0x112   : > { %615 = shalt.err (!%p612_p12)
}
 0x113   : > { %538 = dma.vmem_to_hbm [thread:$0]  (%p742_p5), %s785_s20, 128, %s783_s28, %s358_s4   ;;  %356 = vst [vmem:[%s777_s24] sm:$0xff] %v354_v49 }
 0x114   : > { %s363_s16 = scalar_lea.sflag [#allocation5], %s773_s10  ;;  %s616_s29 = scalar_lea.vmem %s792_s25, 128 }
 0x115   : > { %p617_p13 = scmp.ne.s32.totalorder %s792_s25, %s616_s29  ;;  %s683_s5 = smov [#allocation4]  }
 0x116   : > { %s620_s6 = sshll.u32 %s683_s5, 4  ;;  %s621_s6 = int_to_ptr.vmem [resolvable:$false] %s620_s6 }
 0x117   : > { %p618_p0 = pnand %p617_p13, %p742_p5  ;;  %s622_s7 = scalar_lea.vmem %s621_s6, 256 }
 0x118   : > { %p623_p2 = scmp.lt.s32.totalorder %s792_s25, %s621_s6  ;;  %p624_p3 = scmp.lt.s32.totalorder %s622_s7, %s616_s29 }
 0x119   : > { %p619_p1 = pneg %p618_p0 }
 0x11a   : > { %p625_p4 = por %p624_p3, %p623_p2 }
 0x11c   : > { %p626_p7 = pnand %p625_p4, %p619_p1 }
 0x11e   : > { %629 = shalt.err (!%p626_p7)
}
 0x11f   : > { %s630_s20 = scalar_lea.hbm %s790_s30, 128  ;;  %s634_s28 = scalar_lea.hbm %s857_s3, 256 }
 0x120   : > { %p631_p8 = scmp.ne.s32.totalorder %s790_s30, %s630_s20  ;;  %p635_p11 = scmp.lt.s32.totalorder %s790_s30, %s857_s3 }
 0x121   : > { %p636_p12 = scmp.lt.s32.totalorder %s634_s28, %s630_s20 }
 0x122   : > { %p632_p9 = pnand %p631_p8, %p742_p5 }
 0x123   : > { %p637_p13 = por %p636_p12, %p635_p11 }
 0x124   : > { %p633_p10 = pneg %p632_p9 }
 0x126   : > { %p638_p0 = pnand %p637_p13, %p633_p10 }
 0x128   : > { %641 = shalt.err (!%p638_p0)
}
 0x129   : > { %539 = dma.vmem_to_hbm [thread:$0]  (%p742_p5), %s792_s25, 128, %s790_s30, %s363_s16  }
 0x12a PF: > { %p549_p1 = scmp.ge.s32.totalorder %s680_s15, 2  ;;  %s401_s9 = sand.u32 1, %s668_s12  }
 0x12b   : > { %s402_s11 = scalar_lea.sflag [#allocation3], %s401_s9 }
 0x12c   : > { %p543_p2 = pnand %p549_p1, %p746_p6 }
 0x12e   : > { %p544_p3 = pneg %p543_p2 }
 0x130   : > { %659 = dma.done.wait (%p544_p3), %s402_s11, 128  }
 0x131   : > { %661 = vsyncadd (%p544_p3), %s402_s11, 4294967168  ;;  %s411_s17 = scalar_lea.sflag [#allocation5], %s401_s9 }
 0x132   : > { %663 = dma.done.wait (%p544_p3), %s411_s17, 128  }
 0x133   : > { %665 = vsyncadd (%p544_p3), %s411_s17, 4294967168  ;;  %p17_p5 = scmp.ge.s32.totalorder %s729_s18, 4   ;;  %s860_s12 = smov %s672_s13 }
 0x134   : > { %s861_s13 = smov %s676_s14  ;;  %s862_s14 = smov %s740_s21 }
 0x135   : > { %s863_s15 = smov %s729_s18  ;;  %19 = sbr.rel (!%p17_p5) target bundleno = 5 (0x5), region = 80 }
 0x13a   :  { %416 = vsyncpa [#allocation3], 1 }
 0x13b   :  { %418 = vsyncpa [#allocation3 + $0x1], 1 }
 0x13c   :  { %419 = vsyncpa [#allocation5], 1 }
 0x13d   :  { %421 = vsyncpa [#allocation5 + $0x1], 1 }

</bundles_post_ra>
